<compile_context>
chip_gen: v6e
topology: v6e:2x2x1
jax: 0.10.0
libtpu: 0.0.40
codegen_flags: <defaults>
</compile_context>

<pallas_src>
import numpy as np
import jax
import jax.numpy as jnp
from jax.experimental import pallas as pl
from jax.experimental.pallas import tpu as pltpu


# ----------------------------------------------------------------------------
# Pallas kernel: one (spatial-tile t, batch b) grid step.
#   sa, ca : (1, C, W) bf16   amp*sin(A), amp*cos(A),  A = 2*pi*(f0*gx + ph)
#   cb, sb : (1, C, H) bf16   cos(B),     sin(B),      B = 2*pi*(f1*gy)
#   ew     : (W, T)    bf16   one-hot width  selector per flat column (0 in pad)
#   eh     : (H, T)    bf16   one-hot height selector per flat column (0 in pad)
#   wm     : (C, C)    bf16   weight / sqrt(C)   (constant index map)
#   out    : (1, C, T) f32
# ----------------------------------------------------------------------------
def _synthesis_input_kernel(sa_ref, ca_ref, cb_ref, sb_ref,
                            ew_ref, eh_ref, w_ref, out_ref):
    ew = ew_ref[...]                     # (W, T) bf16
    eh = eh_ref[...]                     # (H, T) bf16

    # Expand the separable trig factors onto the T flat spatial lanes with
    # exact one-hot bf16 selection matmuls (single-pass MXU), then combine:
    #   sin(A + B) = sin(A)*cos(B) + cos(A)*sin(B)
    # Peak live intermediates stay at (C, T) f32 slabs (never (2C, T)).
    feat = (jnp.dot(sa_ref[0], ew, preferred_element_type=jnp.float32)
            * jnp.dot(cb_ref[0], eh, preferred_element_type=jnp.float32))
    feat = feat + (jnp.dot(ca_ref[0], ew, preferred_element_type=jnp.float32)
                   * jnp.dot(sb_ref[0], eh, preferred_element_type=jnp.float32))

    # Channel mixing on the MXU: bf16 inputs, f32 accumulation.
    # (On v7x an fp8 weight with a per-tensor scale would roughly double MXU
    #  rate for this dominant matmul; not enabled here to keep accuracy.)
    out_ref[0] = jnp.dot(w_ref[...], feat.astype(w_ref.dtype),
                         preferred_element_type=jnp.float32)


# ----------------------------------------------------------------------------
# Parameter init, faithful to SynthesisInput.__init__ shapes/semantics.
# ----------------------------------------------------------------------------
def init_params(key, w_dim, channels, bandwidth):
    k1, k2, k3, k4 = jax.random.split(key, 4)
    freqs = jax.random.normal(k1, (channels, 2), dtype=jnp.float32)
    radii = jnp.sqrt(jnp.sum(freqs ** 2, axis=1, keepdims=True))
    freqs = freqs / (radii * jnp.exp(radii ** 2) ** 0.25)
    freqs = freqs * bandwidth
    phases = jax.random.uniform(k2, (channels,), dtype=jnp.float32) - 0.5
    weight = jax.random.normal(k3, (channels, channels), dtype=jnp.float32)
    # affine = FullyConnectedLayer(w_dim, 4, weight_init=0, bias_init=[1,0,0,0])
    affine_w = jax.random.normal(k4, (4, w_dim), dtype=jnp.float32) * 0.0
    affine_b = jnp.array([1.0, 0.0, 0.0, 0.0], dtype=jnp.float32)
    transform = jnp.eye(3, dtype=jnp.float32)
    return dict(freqs=freqs, phases=phases, weight=weight,
                affine_w=affine_w, affine_b=affine_b, transform=transform)


# ----------------------------------------------------------------------------
# Small per-batch setup (affine FC, rotation/translation transforms) -- glue.
# ----------------------------------------------------------------------------
def _transform_setup(w, params, *, sampling_rate, bandwidth):
    B = w.shape[0]
    w_dim = w.shape[1]
    gain = 1.0 / np.sqrt(w_dim)
    t = w @ (params["affine_w"] * gain).T + params["affine_b"][None, :]   # (B,4)
    t = t / jnp.linalg.norm(t[:, :2], axis=1, keepdims=True)

    eye3 = jnp.eye(3, dtype=w.dtype)
    m_r = jnp.tile(eye3[None], (B, 1, 1))
    m_r = (m_r.at[:, 0, 0].set(t[:, 0]).at[:, 0, 1].set(-t[:, 1])
               .at[:, 1, 0].set(t[:, 1]).at[:, 1, 1].set(t[:, 0]))
    m_t = jnp.tile(eye3[None], (B, 1, 1))
    m_t = m_t.at[:, 0, 2].set(-t[:, 2]).at[:, 1, 2].set(-t[:, 3])
    transforms = m_r @ m_t @ params["transform"][None]                    # (B,3,3)

    freqs = params["freqs"]      # (C, 2)
    phases = params["phases"]    # (C,)
    phases_t = phases[None, :] + jnp.einsum(
        "cd,bd->bc", freqs, transforms[:, :2, 2])                         # (B,C)
    freqs_t = jnp.einsum("cd,bde->bce", freqs, transforms[:, :2, :2])     # (B,C,2)
    amps = jnp.clip(
        1.0 - (jnp.linalg.norm(freqs_t, axis=2) - bandwidth)
        / (sampling_rate / 2.0 - bandwidth), 0.0, 1.0)                    # (B,C)
    return freqs_t, phases_t, amps


# ----------------------------------------------------------------------------
# Tile / VMEM sizing.
# ----------------------------------------------------------------------------
def _round_up(x, m):
    return ((x + m - 1) // m) * m


def _vmem_estimate(C, Wsz, Hsz, T):
    """Conservative per-step VMEM footprint (double-buffered blocks + temps)."""
    bf16, f32 = 2, 4
    sel = 2 * 2 * (Wsz + Hsz) * T * bf16        # ew + eh tiles, double-buffered
    trig = 2 * 2 * C * (Wsz + Hsz) * bf16       # 4 factor blocks, double-buffered
    weight = 2 * C * C * bf16                   # constant index map, 2 buffers
    out = 2 * C * T * f32
    scratch = 4 * C * T * f32                   # feat accumulator + matmul temps
    return sel + trig + weight + out + scratch


def _choose_tile_lanes(HW, C, Wsz, Hsz, max_tile_lanes, vmem_budget):
    # Largest lane-dense tile <= max_tile_lanes that fits the VMEM budget.
    # No divisor constraint: HW is padded up to a multiple of T afterwards.
    T = min(_round_up(max(HW, 1), 128), _round_up(max(max_tile_lanes, 128), 128))
    while T > 128 and _vmem_estimate(C, Wsz, Hsz, T) > vmem_budget:
        T = max(128, _round_up(T // 2, 128))
    return T


# ----------------------------------------------------------------------------
# Forward pass: tiny JAX glue + Pallas kernel.
# ----------------------------------------------------------------------------
def synthesis_input_forward(w, params, *, channels, size, sampling_rate,
                            bandwidth, max_tile_lanes=1024,
                            vmem_budget_bytes=48 * 2 ** 20,
                            return_padded_flat=False):
    # max_tile_lanes=1024 / budget=48 MiB is safe on v5e/v6e/v7x; on v6e
    # (128 MiB VMEM) raising both (e.g. 2048 lanes / 96 MiB) is beneficial.
    size = np.broadcast_to(np.asarray(size), [2])
    Wsz, Hsz = int(size[0]), int(size[1])        # size[0]=width, size[1]=height
    B = w.shape[0]
    C = channels
    HW = Hsz * Wsz
    T = _choose_tile_lanes(HW, C, Wsz, Hsz, max_tile_lanes, vmem_budget_bytes)
    n_t = -(-HW // T)                            # ceil
    HW_pad = n_t * T                             # pad up to a multiple of T

    freqs_t, phases_t, amps = _transform_setup(
        w, params, sampling_rate=sampling_rate, bandwidth=bandwidth)

    # --- Separable trig factor tables: B*C*(H+W) transcendentals (tiny) -----
    two_pi = np.float32(2.0 * np.pi)
    gx = (0.5 * Wsz / sampling_rate) * (
        (2.0 * jnp.arange(Wsz, dtype=jnp.float32) + 1.0) / Wsz - 1.0)     # (W,)
    gy = (0.5 * Hsz / sampling_rate) * (
        (2.0 * jnp.arange(Hsz, dtype=jnp.float32) + 1.0) / Hsz - 1.0)     # (H,)
    arg_a = two_pi * (freqs_t[:, :, 0:1] * gx[None, None, :]
                      + phases_t[:, :, None])                             # (B,C,W)
    arg_b = two_pi * (freqs_t[:, :, 1:2] * gy[None, None, :])             # (B,C,H)
    amp = amps[:, :, None]                                                # (B,C,1)
    sin_a = (amp * jnp.sin(arg_a)).astype(jnp.bfloat16)                   # (B,C,W)
    cos_a = (amp * jnp.cos(arg_a)).astype(jnp.bfloat16)                   # (B,C,W)
    cos_b = jnp.cos(arg_b).astype(jnp.bfloat16)                           # (B,C,H)
    sin_b = jnp.sin(arg_b).astype(jnp.bfloat16)                           # (B,C,H)

    # --- One-hot selection matrices (trace-time constants), zero in pad -----
    # 0/1 values are exact in bf16, so the expansion matmuls are exact selects.
    hw = np.arange(HW_pad)
    valid = hw < HW
    ew_np = ((hw % Wsz)[None, :] == np.arange(Wsz)[:, None]) & valid[None, :]
    eh_np = ((hw // Wsz)[None, :] == np.arange(Hsz)[:, None]) & valid[None, :]
    ew = jnp.asarray(ew_np.astype(np.float32), dtype=jnp.bfloat16)        # (W,HW_pad)
    eh = jnp.asarray(eh_np.astype(np.float32), dtype=jnp.bfloat16)        # (H,HW_pad)

    w_scaled = (params["weight"] / np.sqrt(C)).astype(jnp.bfloat16)       # (C,C)

    vmem_limit = int(min(64 * 2 ** 20,
                         max(32 * 2 ** 20,
                             _vmem_estimate(C, Wsz, Hsz, T) + 8 * 2 ** 20)))

    # Grid is (n_t, B): the constant ew/eh tiles keep the same block index while
    # b varies (inner axis), so each selector tile is DMA'd once total instead
    # of once per batch element; the per-batch trig tables that re-stream
    # instead are only C*(H+W) bf16 each.
    out_flat = pl.pallas_call(
        _synthesis_input_kernel,
        out_shape=jax.ShapeDtypeStruct((B, C, HW_pad), jnp.float32),
        grid_spec=pltpu.PrefetchScalarGridSpec(
            num_scalar_prefetch=0,
            grid=(n_t, B),
            in_specs=[
                pl.BlockSpec((1, C, Wsz), lambda t, b: (b, 0, 0)),   # sin_a
                pl.BlockSpec((1, C, Wsz), lambda t, b: (b, 0, 0)),   # cos_a
                pl.BlockSpec((1, C, Hsz), lambda t, b: (b, 0, 0)),   # cos_b
                pl.BlockSpec((1, C, Hsz), lambda t, b: (b, 0, 0)),   # sin_b
                pl.BlockSpec((Wsz, T), lambda t, b: (0, t)),         # ew tile
                pl.BlockSpec((Hsz, T), lambda t, b: (0, t)),         # eh tile
                pl.BlockSpec((C, C), lambda t, b: (0, 0)),           # weight
            ],
            out_specs=pl.BlockSpec((1, C, T), lambda t, b: (b, 0, t)),
        ),
        compiler_params=pltpu.CompilerParams(
            dimension_semantics=("parallel", "parallel"),
            vmem_limit_bytes=vmem_limit),
    )(sin_a, cos_a, cos_b, sin_b, ew, eh, w_scaled)

    if return_padded_flat:
        # Pad columns are exactly zero; a jit-ted consumer can slice/reshape
        # lazily and avoid an extra full-output HBM round trip here.
        return out_flat
    if HW_pad != HW:
        out_flat = out_flat[:, :, :HW]
    # NCHW output, identical to the PyTorch module: [B, C, size[1], size[0]]
    return out_flat.reshape(B, C, Hsz, Wsz)


# ----------------------------------------------------------------------------
# Pure-JAX reference for correctness checking (f32, non-separable form).
# ----------------------------------------------------------------------------
def synthesis_input_reference(w, params, *, channels, size, sampling_rate,
                              bandwidth):
    size = np.broadcast_to(np.asarray(size), [2])
    Wsz, Hsz = int(size[0]), int(size[1])
    C = channels
    freqs_t, phases_t, amps = _transform_setup(
        w, params, sampling_rate=sampling_rate, bandwidth=bandwidth)

    gx = (0.5 * Wsz / sampling_rate) * (
        (2.0 * jnp.arange(Wsz, dtype=jnp.float32) + 1.0) / Wsz - 1.0)
    gy = (0.5 * Hsz / sampling_rate) * (
        (2.0 * jnp.arange(Hsz, dtype=jnp.float32) + 1.0) / Hsz - 1.0)

    arg = (gx[None, None, :, None] * freqs_t[:, None, None, :, 0]
           + gy[None, :, None, None] * freqs_t[:, None, None, :, 1]
           + phases_t[:, None, None, :])
    x = jnp.sin(arg * (2.0 * np.pi)) * amps[:, None, None, :]
    w_scaled = params["weight"] / np.sqrt(C)
    x = jnp.einsum("bhwc,dc->bhwd", x, w_scaled,
                   precision=jax.lax.Precision.HIGHEST)
    return jnp.transpose(x, (0, 3, 1, 2))   # NCHW


if __name__ == "__main__":
    # Small shapes consistent with the module.
    B = 2
    w_dim = 8
    channels = 16
    sampling_rate = 16.0
    bandwidth = 2.0
    # Tolerance covers bf16 trig factors + bf16 channel-mix matmul (f32 accum).
    TOL = 6e-2

    key = jax.random.PRNGKey(0)
    kp, kw = jax.random.split(key)
    params = init_params(kp, w_dim, channels, bandwidth)
    w_lat = jax.random.normal(kw, (B, w_dim), dtype=jnp.float32)

    # Case 1: 16x16 -> HW=256, single 256-lane tile per batch element.
    size = 16
    ref = jax.block_until_ready(synthesis_input_reference(
        w_lat, params, channels=channels, size=size,
        sampling_rate=sampling_rate, bandwidth=bandwidth))
    out = jax.block_until_ready(synthesis_input_forward(
        w_lat, params, channels=channels, size=size,
        sampling_rate=sampling_rate, bandwidth=bandwidth))
    assert out.shape == (B, channels, size, size), out.shape
    err = float(jnp.max(jnp.abs(out - ref)))
    assert err < TOL, f"max abs error {err}"

    # Case 2: forced multi-tile path (T=128 -> 2 spatial tiles per batch).
    out2 = jax.block_until_ready(synthesis_input_forward(
        w_lat, params, channels=channels, size=size,
        sampling_rate=sampling_rate, bandwidth=bandwidth,
        max_tile_lanes=128))
    err2 = float(jnp.max(jnp.abs(out2 - ref)))
    assert err2 < TOL, f"max abs error (tiled) {err2}"

    # Case 3: 12x12 -> HW=144, padded up to 256 lanes (exercises the
    # non-divisor / zero-padded-column path of the fixed tile chooser).
    size3 = 12
    ref3 = jax.block_until_ready(synthesis_input_reference(
        w_lat, params, channels=channels, size=size3,
        sampling_rate=sampling_rate, bandwidth=bandwidth))
    out3 = jax.block_until_ready(synthesis_input_forward(
        w_lat, params, channels=channels, size=size3,
        sampling_rate=sampling_rate, bandwidth=bandwidth))
    assert out3.shape == (B, channels, size3, size3), out3.shape
    err3 = float(jnp.max(jnp.abs(out3 - ref3)))
    assert err3 < TOL, f"max abs error (padded) {err3}"

    print("KERNEL_OK")
</pallas_src>

<mosaic_0001>
module attributes {stable_mosaic.version = 11 : i64} {
  func.func @_synthesis_input_kernel(%arg0: i32, %arg1: i32, %arg2: memref<1x16x16xbf16, #tpu.memory_space<vmem>>, %arg3: memref<1x16x16xbf16, #tpu.memory_space<vmem>>, %arg4: memref<1x16x16xbf16, #tpu.memory_space<vmem>>, %arg5: memref<1x16x16xbf16, #tpu.memory_space<vmem>>, %arg6: memref<16x256xbf16, #tpu.memory_space<vmem>>, %arg7: memref<16x256xbf16, #tpu.memory_space<vmem>>, %arg8: memref<16x16xbf16, #tpu.memory_space<vmem>>, %arg9: memref<1x16x256xf32, #tpu.memory_space<vmem>>) attributes {dimension_semantics = [#tpu.dimension_semantics<parallel>, #tpu.dimension_semantics<parallel>], iteration_bounds = array<i64: 1, 2>, scalar_prefetch = 0 : i64, scratch_operands = 0 : i64, tpu.core_type = #tpu.core_type<tc>, window_params = [{transform_indices = @transform_0, window_bounds = array<i64: 1, 16, 16>}, {transform_indices = @transform_1, window_bounds = array<i64: 1, 16, 16>}, {transform_indices = @transform_2, window_bounds = array<i64: 1, 16, 16>}, {transform_indices = @transform_3, window_bounds = array<i64: 1, 16, 16>}, {transform_indices = @transform_4, window_bounds = array<i64: 16, 256>}, {transform_indices = @transform_5, window_bounds = array<i64: 16, 256>}, {pipeline_mode = #tpu.pipeline_mode<synchronous>, transform_indices = @transform_6, window_bounds = array<i64: 16, 16>}, {transform_indices = @transform_7, window_bounds = array<i64: 1, 16, 256>}]} {
    %c0 = arith.constant 0 : index
    %c0_0 = arith.constant 0 : index
    %0 = vector.load %arg6[%c0, %c0_0] : memref<16x256xbf16, #tpu.memory_space<vmem>>, vector<16x256xbf16>
    %c0_1 = arith.constant 0 : index
    %c0_2 = arith.constant 0 : index
    %1 = vector.load %arg7[%c0_1, %c0_2] : memref<16x256xbf16, #tpu.memory_space<vmem>>, vector<16x256xbf16>
    %c0_3 = arith.constant 0 : index
    %c0_4 = arith.constant 0 : index
    %c0_5 = arith.constant 0 : index
    %2 = vector.load %arg2[%c0_3, %c0_4, %c0_5] : memref<1x16x16xbf16, #tpu.memory_space<vmem>>, vector<1x16x16xbf16>
    %3 = vector.shape_cast %2 : vector<1x16x16xbf16> to vector<16x16xbf16>
    %cst = arith.constant dense<0.000000e+00> : vector<16x256xf32>
    %4 = tpu.matmul %3, %0, %cst {dimension_numbers = #tpu.dot_dimension_numbers<[1], [0], [0], [1], [0, 0, 1, 1], [], []>} : vector<16x16xbf16>, vector<16x256xbf16>, vector<16x256xf32> -> vector<16x256xf32>
    %c0_6 = arith.constant 0 : index
    %c0_7 = arith.constant 0 : index
    %c0_8 = arith.constant 0 : index
    %5 = vector.load %arg4[%c0_6, %c0_7, %c0_8] : memref<1x16x16xbf16, #tpu.memory_space<vmem>>, vector<1x16x16xbf16>
    %6 = vector.shape_cast %5 : vector<1x16x16xbf16> to vector<16x16xbf16>
    %cst_9 = arith.constant dense<0.000000e+00> : vector<16x256xf32>
    %7 = tpu.matmul %6, %1, %cst_9 {dimension_numbers = #tpu.dot_dimension_numbers<[1], [0], [0], [1], [0, 0, 1, 1], [], []>} : vector<16x16xbf16>, vector<16x256xbf16>, vector<16x256xf32> -> vector<16x256xf32>
    %8 = arith.mulf %4, %7 : vector<16x256xf32>
    %c0_10 = arith.constant 0 : index
    %c0_11 = arith.constant 0 : index
    %c0_12 = arith.constant 0 : index
    %9 = vector.load %arg3[%c0_10, %c0_11, %c0_12] : memref<1x16x16xbf16, #tpu.memory_space<vmem>>, vector<1x16x16xbf16>
    %10 = vector.shape_cast %9 : vector<1x16x16xbf16> to vector<16x16xbf16>
    %cst_13 = arith.constant dense<0.000000e+00> : vector<16x256xf32>
    %11 = tpu.matmul %10, %0, %cst_13 {dimension_numbers = #tpu.dot_dimension_numbers<[1], [0], [0], [1], [0, 0, 1, 1], [], []>} : vector<16x16xbf16>, vector<16x256xbf16>, vector<16x256xf32> -> vector<16x256xf32>
    %c0_14 = arith.constant 0 : index
    %c0_15 = arith.constant 0 : index
    %c0_16 = arith.constant 0 : index
    %12 = vector.load %arg5[%c0_14, %c0_15, %c0_16] : memref<1x16x16xbf16, #tpu.memory_space<vmem>>, vector<1x16x16xbf16>
    %13 = vector.shape_cast %12 : vector<1x16x16xbf16> to vector<16x16xbf16>
    %cst_17 = arith.constant dense<0.000000e+00> : vector<16x256xf32>
    %14 = tpu.matmul %13, %1, %cst_17 {dimension_numbers = #tpu.dot_dimension_numbers<[1], [0], [0], [1], [0, 0, 1, 1], [], []>} : vector<16x16xbf16>, vector<16x256xbf16>, vector<16x256xf32> -> vector<16x256xf32>
    %15 = arith.mulf %11, %14 : vector<16x256xf32>
    %16 = arith.addf %8, %15 : vector<16x256xf32>
    %c0_18 = arith.constant 0 : index
    %c0_19 = arith.constant 0 : index
    %17 = vector.load %arg8[%c0_18, %c0_19] : memref<16x16xbf16, #tpu.memory_space<vmem>>, vector<16x16xbf16>
    %18 = arith.truncf %16 : vector<16x256xf32> to vector<16x256xbf16>
    %cst_20 = arith.constant dense<0.000000e+00> : vector<16x256xf32>
    %19 = tpu.matmul %17, %18, %cst_20 {dimension_numbers = #tpu.dot_dimension_numbers<[1], [0], [0], [1], [0, 0, 1, 1], [], []>} : vector<16x16xbf16>, vector<16x256xbf16>, vector<16x256xf32> -> vector<16x256xf32>
    %c0_21 = arith.constant 0 : index
    %c0_22 = arith.constant 0 : index
    %c0_23 = arith.constant 0 : index
    %20 = vector.load %arg9[%c0_21, %c0_22, %c0_23] : memref<1x16x256xf32, #tpu.memory_space<vmem>>, vector<1x16x256xf32>
    %21 = vector.shape_cast %20 : vector<1x16x256xf32> to vector<16x256xf32>
    %22 = vector.shape_cast %19 : vector<16x256xf32> to vector<1x16x256xf32>
    tpu.vector_store %arg9[%c0_21, %c0_22, %c0_23], %22 {strides = array<i32>} : memref<1x16x256xf32, #tpu.memory_space<vmem>>, vector<1x16x256xf32>,
    return
  }
  func.func @transform_0(%arg0: i32, %arg1: i32) -> (i32, i32, i32) {
    %c0_i32 = arith.constant 0 : i32
    %c0_i32_0 = arith.constant 0 : i32
    %c0_i32_1 = arith.constant 0 : i32
    return %arg1, %c0_i32, %c0_i32_0 : i32, i32, i32
  }
  func.func @transform_1(%arg0: i32, %arg1: i32) -> (i32, i32, i32) {
    %c0_i32 = arith.constant 0 : i32
    %c0_i32_0 = arith.constant 0 : i32
    %c0_i32_1 = arith.constant 0 : i32
    return %arg1, %c0_i32, %c0_i32_0 : i32, i32, i32
  }
  func.func @transform_2(%arg0: i32, %arg1: i32) -> (i32, i32, i32) {
    %c0_i32 = arith.constant 0 : i32
    %c0_i32_0 = arith.constant 0 : i32
    %c0_i32_1 = arith.constant 0 : i32
    return %arg1, %c0_i32, %c0_i32_0 : i32, i32, i32
  }
  func.func @transform_3(%arg0: i32, %arg1: i32) -> (i32, i32, i32) {
    %c0_i32 = arith.constant 0 : i32
    %c0_i32_0 = arith.constant 0 : i32
    %c0_i32_1 = arith.constant 0 : i32
    return %arg1, %c0_i32, %c0_i32_0 : i32, i32, i32
  }
  func.func @transform_4(%arg0: i32, %arg1: i32) -> (i32, i32) {
    %c0_i32 = arith.constant 0 : i32
    %c0_i32_0 = arith.constant 0 : i32
    return %c0_i32, %arg0 : i32, i32
  }
  func.func @transform_5(%arg0: i32, %arg1: i32) -> (i32, i32) {
    %c0_i32 = arith.constant 0 : i32
    %c0_i32_0 = arith.constant 0 : i32
    return %c0_i32, %arg0 : i32, i32
  }
  func.func @transform_6(%arg0: i32, %arg1: i32) -> (i32, i32) {
    %c0_i32 = arith.constant 0 : i32
    %c0_i32_0 = arith.constant 0 : i32
    %c0_i32_1 = arith.constant 0 : i32
    return %c0_i32, %c0_i32_0 : i32, i32
  }
  func.func @transform_7(%arg0: i32, %arg1: i32) -> (i32, i32, i32) {
    %c0_i32 = arith.constant 0 : i32
    %c0_i32_0 = arith.constant 0 : i32
    return %arg1, %c0_i32, %arg0 : i32, i32, i32
  }
}

</mosaic_0001>

<bundles_post_ra>
// kernel: tpu_custom_call.1
= control target key start
LH: loop header
LB: loop body
LE: loop exit
PB: predicated region body
PF: predicated region fallthrough
CT: control target
= control target key end

     0   :  { %s1754_s0 = inlined_call_operand.hbm [shape: bf16[2,16,16], index: 0, kind: input, shape index: {}]   ;;  %s1755_s1 = inlined_call_operand.hbm [shape: bf16[2,16,16], index: 1, kind: input, shape index: {}]   ;;  %s1756_s2 = inlined_call_operand.hbm [shape: bf16[2,16,16], index: 2, kind: input, shape index: {}]   ;;  %s1757_s3 = inlined_call_operand.hbm [shape: bf16[2,16,16], index: 3, kind: input, shape index: {}]   ;;  %s1758_s4 = inlined_call_operand.hbm [shape: bf16[16,256], index: 4, kind: input, shape index: {}]   ;;  %s1759_s5 = inlined_call_operand.hbm [shape: bf16[16,256], index: 5, kind: input, shape index: {}]   ;;  %s1760_s6 = inlined_call_operand.vmem [shape: bf16[16,16], index: 6, kind: input, shape index: {}]   ;;  %s1761_s7 = inlined_call_operand.hbm [shape: f32[2,16,256], index: 7, kind: output, shape index: {}]  }
   0x1   :  { %1776 = sst [smem:[#allocation25_spill]] %s1754_s0 }
   0x2   :  { %1777 = sst [smem:[#allocation26_spill]] %s1755_s1 }
   0x3   :  { %1778 = sst [smem:[#allocation27_spill]] %s1758_s4 }
   0x4   :  { %1779 = sst [smem:[#allocation28_spill]] %s1761_s7 }
   0x5   :  { %12 = vsyncpa [#allocation3], 0 }
   0x6   :  { %14 = vsyncpa [#allocation3 + $0x1], 0 }
   0x7   :  { %15 = vsyncpa [#allocation6], 0 }
   0x8   :  { %17 = vsyncpa [#allocation6 + $0x1], 0 }
   0x9   :  { %18 = vsyncpa [#allocation9], 0 }
   0xa   :  { %20 = vsyncpa [#allocation9 + $0x1], 0 }
   0xb   :  { %21 = vsyncpa [#allocation12], 0 }
   0xc   :  { %22 = vsyncpa [#allocation4], 0 }
   0xd   :  { %24 = vsyncpa [#allocation4 + $0x1], 0  ;;  %s1456_s24 = smov 0   ;;  %s1458_s25 = smov 0  }
   0xe   :  { %s1460_s26 = smov 0   ;;  %s1462_s27 = smov 0  }
   0xf   :  { %s1464_s28 = smov 0   ;;  %s1466_s29 = smov 0  }
  0x10 LB: > { %1780 = sst [smem:[#allocation20_spill]] %s1380_s24  ;;  %s1487_s30 = sadd.s32 4294967295, %s1400_s29   ;;  %s1400_s29 = sphi %s1466_s29, %s30_s29   ;;  %s1396_s28 = sphi %s1464_s28, %s1815_s28   ;;  %s1392_s27 = sphi %s1462_s27, %s1814_s27   ;;  %s1388_s26 = sphi %s1460_s26, %s1818_s26   ;;  %s1384_s25 = sphi %s1458_s25, %s1817_s25   ;;  %s1380_s24 = sphi %s1456_s24, %s1816_s24  }
  0x11   : > { %1781 = sst [smem:[#allocation21_spill]] %s1396_s28  ;;  %s975_s8 = sadd.s32 4294967294, %s1400_s29  }
  0x12   : > { %p56_p0 = scmp.ne.s32.totalorder %s1388_s26, %s1384_s25  ;;  %p57_p1 = scmp.eq.s32.totalorder %s1400_s29, 0 }
  0x13   : > { %p62_p2 = scmp.ne.s32.totalorder %s1384_s25, %s1380_s24  ;;  %p1762_p3 = scmp.eq.s32.totalorder %s1487_s30, 0 }
  0x14   : > { %p239_p4 = scmp.eq.s32.totalorder %s1487_s30, 1  ;;  %p1498_p5 = por %p57_p1, %p56_p0 }
  0x15   : > { %p245_p6 = scmp.eq.s32.totalorder %s975_s8, 1  ;;  %p1504_p7 = por %p1762_p3, %p62_p2 }
  0x16   : > { %p1508_p8 = por %p239_p4, %p56_p0  ;;  %p976_p10 = scmp.ge.s32.totalorder %s1400_s29, 1 }
  0x17   : > { %p1512_p9 = por %p245_p6, %p62_p2  ;;  %p252_p11 = scmp.lt.s32.totalorder %s1400_s29, 3 }
  0x18   : > { %s1402_s15 = smov [#allocation10]   ;;  %s39_s18 = sadd.s32 1, %s1396_s28 }
  0x19   : > { %s1785_s13 = scalar_select %p1512_p9, 1, 0 }
  0x1a   : > { %p1518_p12 = pnand %p976_p10, %p252_p11  ;;  %s267_s16 = sshll.u32 %s1402_s15, 4  ;;  %s268_s16 = int_to_ptr.vmem [resolvable:$true] %s267_s16 }
  0x1b   : > { %1786 = sst [smem:[#allocation22_spill]] %s1785_s13  ;;  %s1765_s19 = sand.u32 1, %s1388_s26  }
  0x1c   : > { %p1042_p13 = pneg %p1518_p12  ;;  %p1534_p2 = scmp.ge.s32.totalorder %s39_s18, 2 }
  0x1d   : > { %s1151_s21 = scalar_lea.vmem %s268_s16, 256 }
  0x1e   : > { %p1528_p4 = pnand %p1042_p13, %p1762_p3  ;;  %p1152_p10 = scmp.ne.s32.totalorder %s268_s16, %s1151_s21 }
  0x1f   : > { %p1159_p13 = scmp.lt.s32.totalorder %s268_s16, %s268_s16  ;;  %p1160_p3 = scmp.lt.s32.totalorder %s1151_s21, %s1151_s21 }
  0x20   : > { %p1142_p6 = pneg %p1528_p4 }
  0x21   : > { %p1161_p1 = por %p1160_p3, %p1159_p13 }
  0x22   : > { %p1154_p11 = pnand %p1152_p10, %p1142_p6 }
  0x24   : > { %p1155_p0 = pneg %p1154_p11 }
  0x26   : > { %p1162_p9 = pnand %p1161_p1, %p1155_p0 }
  0x28   : > { %1165 = shalt.err (!%p1162_p9)
}
  0x29   : > { %s1766_s22 = smov 128   ;;  %s1767_s23 = smov 8  }
  0x2a   : > { %s1790_s4 = sld [smem:[#allocation27_spill]]  ;;  %s1820_s18 = smov (%p1534_p2, %s39_s18), 0 }
  0x2b   : > { %1791 = sst [smem:[#allocation23_spill]] %s1820_s18  ;;  %s1557_s21 = sshll.u32 %s1765_s19, 3 }
  0x2c   : > { %s1560_s9 = sshll.u32 %s1396_s28, 7  ;;  %s46_s13 = ssub.s32 %s1396_s28, %s1820_s18 }
  0x2d   : > { %p1792_p3 = scmp.lt.s32.totalorder %s1400_s29, 2  ;;  %p47_p0 = scmp.eq.s32.totalorder %s46_s13, 0 }
  0x2e   : > { %s1770_s8 = sand.u32 1, %s1400_s29   ;;  %s1796_s1 = sld [smem:[#allocation26_spill]] }
  0x2f   : > { %p1568_p9 = pnand %p1792_p3, %p1498_p5  ;;  %s1585_s10 = scalar_lea.sflag [#allocation6], %s1770_s8 }
  0x30   : > { %1045 = dma.hbm_to_vmem [thread:$0]  (!%p1528_p4), %s1790_s4, 256, %s268_s16, [#allocation9], %s1766_s22, %s1766_s22, %s1767_s23  }
  0x31   : > { %s1794_s16 = sadd.s32 1, %s1388_s26  ;;  %s325_s23 = scalar_lea.vmem [#allocation5], %s1557_s21 }
  0x32   : > { %s1575_s20 = scalar_select %p47_p0, %s1388_s26, %s1794_s16  }
  0x33   : > { %s332_s4 = sshll.u32 %s325_s23, 4  ;;  %p1168_p5 = pneg %p1568_p9  ;;  %s333_s4 = int_to_ptr.vmem [resolvable:$true] %s332_s4 }
  0x34   : > { %1795 = sst [smem:[#allocation24_spill]] %s1575_s20  ;;  %s331_s22 = scalar_lea.hbm %s1796_s1, %s1560_s9 }
  0x35   : > { %s1179_s18 = scalar_lea.vmem %s333_s4, 128  ;;  %s1405_s13 = smov [#allocation5]  }
  0x36   : > { %p1180_p1 = scmp.ne.s32.totalorder %s333_s4, %s1179_s18  ;;  %s1184_s16 = sshll.u32 %s1405_s13, 4  ;;  %s1185_s16 = int_to_ptr.vmem [resolvable:$false] %s1184_s16 }
  0x37   : > { %s1186_s28 = scalar_lea.vmem %s1185_s16, 256  ;;  %p1187_p11 = scmp.lt.s32.totalorder %s333_s4, %s1185_s16 }
  0x38   : > { %p1182_p2 = pnand %p1180_p1, %p1168_p5  ;;  %p1188_p13 = scmp.lt.s32.totalorder %s1186_s28, %s1179_s18 }
  0x3a   : > { %p1183_p10 = pneg %p1182_p2  ;;  %p1189_p3 = por %p1188_p13, %p1187_p11 }
  0x3c   : > { %p1190_p0 = pnand %p1189_p3, %p1183_p10 }
  0x3e   : > { %1193 = shalt.err (!%p1190_p0)
}
  0x3f   : > { %s1771_s19 = smov 64   ;;  %s1773_s23 = smov 4  }
  0x40   : > { %1055 = dma.hbm_to_vmem [thread:$0]  (!%p1568_p9), %s331_s22, 128, %s333_s4, %s1585_s10, %s1771_s19, %s1771_s19, %s1773_s23  }
  0x41   : > { %s1408_s15 = smov [#allocation11]  }
  0x42   : > { %s283_s8 = sshll.u32 %s1408_s15, 4  ;;  %s284_s8 = int_to_ptr.vmem [resolvable:$true] %s283_s8 }
  0x43   : > { %s1205_s13 = scalar_lea.vmem %s284_s8, 256  ;;  %p1213_p11 = scmp.lt.s32.totalorder %s284_s8, %s284_s8 }
  0x44   : > { %p1206_p1 = scmp.ne.s32.totalorder %s284_s8, %s1205_s13  ;;  %p1214_p13 = scmp.lt.s32.totalorder %s1205_s13, %s1205_s13 }
  0x46   : > { %p1208_p2 = pnand %p1206_p1, %p1142_p6  ;;  %p1215_p3 = por %p1214_p13, %p1213_p11 }
  0x48   : > { %p1209_p10 = pneg %p1208_p2 }
  0x4a   : > { %p1216_p0 = pnand %p1215_p3, %p1209_p10 }
  0x4c   : > { %1219 = shalt.err (!%p1216_p0)
}
  0x4d   : > { %s1797_s28 = smov 8   ;;  %s1798_s18 = smov 128  }
  0x4e   : > { %1048 = dma.hbm_to_vmem [thread:$0]  (!%p1528_p4), %s1759_s5, 256, %s284_s8, [#allocation12], %s1798_s18, %s1798_s18, %s1797_s28  }
  0x4f   : > { %s1799_s0 = sld [smem:[#allocation25_spill]]  ;;  %s304_s19 = scalar_lea.vmem [#allocation2], %s1557_s21 }
  0x50   : > { %s311_s23 = sshll.u32 %s304_s19, 4  ;;  %s1800_s1 = sand.u32 1, %s1388_s26   ;;  %s312_s23 = int_to_ptr.vmem [resolvable:$true] %s311_s23 }
  0x51   : > { %s301_s17 = scalar_lea.sflag [#allocation3], %s1800_s1  ;;  %s1233_s20 = scalar_lea.vmem %s312_s23, 128 }
  0x52   : > { %p1234_p6 = scmp.ne.s32.totalorder %s312_s23, %s1233_s20  ;;  %s1409_s4 = smov [#allocation2]  }
  0x53   : > { %s1238_s22 = sshll.u32 %s1409_s4, 4  ;;  %s1239_s22 = int_to_ptr.vmem [resolvable:$false] %s1238_s22 }
  0x54   : > { %p1236_p1 = pnand %p1234_p6, %p1168_p5  ;;  %s1240_s7 = scalar_lea.vmem %s1239_s22, 256 }
  0x55   : > { %s310_s13 = scalar_lea.hbm %s1799_s0, %s1560_s9  ;;  %p1241_p4 = scmp.lt.s32.totalorder %s312_s23, %s1239_s22 }
  0x56   : > { %p1237_p2 = pneg %p1236_p1  ;;  %p1242_p10 = scmp.lt.s32.totalorder %s1240_s7, %s1233_s20 }
  0x58   : > { %p1243_p11 = por %p1242_p10, %p1241_p4 }
  0x5a   : > { %p1244_p13 = pnand %p1243_p11, %p1237_p2 }
  0x5c   : > { %1247 = shalt.err (!%p1244_p13)
}
  0x5d   : > { %s1801_s8 = smov 4   ;;  %s1802_s19 = smov 64  }
  0x5e   : > { %1052 = dma.hbm_to_vmem [thread:$0]  (!%p1568_p9), %s310_s13, 128, %s312_s23, %s301_s17, %s1802_s19, %s1802_s19, %s1801_s8  }
  0x5f   : > { %s352_s18 = scalar_lea.hbm %s1756_s2, %s1560_s9  ;;  %s346_s16 = scalar_lea.vmem [#allocation7], %s1557_s21 }
  0x60   : > { %s353_s15 = sshll.u32 %s346_s16, 4  ;;  %s1410_s20 = smov [#allocation7]   ;;  %s354_s15 = int_to_ptr.vmem [resolvable:$true] %s353_s15 }
  0x61   : > { %s1261_s7 = scalar_lea.vmem %s354_s15, 128  ;;  %s1266_s4 = sshll.u32 %s1410_s20, 4  ;;  %s1267_s4 = int_to_ptr.vmem [resolvable:$false] %s1266_s4 }
  0x62   : > { %p1262_p3 = scmp.ne.s32.totalorder %s354_s15, %s1261_s7  ;;  %s1268_s22 = scalar_lea.vmem %s1267_s4, 256 }
  0x63   : > { %p1269_p1 = scmp.lt.s32.totalorder %s354_s15, %s1267_s4  ;;  %p1270_p2 = scmp.lt.s32.totalorder %s1268_s22, %s1261_s7 }
  0x64   : > { %p1264_p0 = pnand %p1262_p3, %p1168_p5 }
  0x65   : > { %p1271_p4 = por %p1270_p2, %p1269_p1 }
  0x66   : > { %p1265_p6 = pneg %p1264_p0 }
  0x68   : > { %p1272_p10 = pnand %p1271_p4, %p1265_p6 }
  0x6a   : > { %1275 = shalt.err (!%p1272_p10)
}
  0x6b   : > { %1058 = dma.hbm_to_vmem [thread:$0]  (!%p1568_p9), %s352_s18, 128, %s354_s15, %s1585_s10, %s1802_s19, %s1802_s19, %s1801_s8  }
  0x6c   : > { %s373_s17 = scalar_lea.hbm %s1757_s3, %s1560_s9  ;;  %s367_s1 = scalar_lea.vmem [#allocation8], %s1557_s21 }
  0x6d   : > { %s374_s28 = sshll.u32 %s367_s1, 4  ;;  %s1803_s16 = sand.u32 1, %s1400_s29   ;;  %s375_s28 = int_to_ptr.vmem [resolvable:$true] %s374_s28 }
  0x6e   : > { %s364_s7 = scalar_lea.sflag [#allocation9], %s1803_s16  ;;  %s1289_s20 = scalar_lea.vmem %s375_s28, 128 }
  0x6f   : > { %p1290_p11 = scmp.ne.s32.totalorder %s375_s28, %s1289_s20  ;;  %s1411_s4 = smov [#allocation8]  }
  0x70   : > { %s1294_s22 = sshll.u32 %s1411_s4, 4  ;;  %s1295_s22 = int_to_ptr.vmem [resolvable:$false] %s1294_s22 }
  0x71   : > { %p1292_p13 = pnand %p1290_p11, %p1168_p5  ;;  %s1296_s0 = scalar_lea.vmem %s1295_s22, 256 }
  0x72   : > { %p1297_p0 = scmp.lt.s32.totalorder %s375_s28, %s1295_s22  ;;  %p1298_p6 = scmp.lt.s32.totalorder %s1296_s0, %s1289_s20 }
  0x73   : > { %p1293_p3 = pneg %p1292_p13 }
  0x74   : > { %p1299_p1 = por %p1298_p6, %p1297_p0 }
  0x76   : > { %p1300_p2 = pnand %p1299_p1, %p1293_p3 }
  0x78   : > { %1303 = shalt.err (!%p1300_p2)
}
  0x79   : > { %1061 = dma.hbm_to_vmem [thread:$0]  (!%p1568_p9), %s373_s17, 128, %s375_s28, %s364_s7, %s1802_s19, %s1802_s19, %s1801_s8  }
  0x7a   : > { %386 = sbr.rel (%p1518_p12) target bundleno = 577 (0x241), region = 48  ;;  %s1656_s9 = sand.u32 (!%p1518_p12), 1, %s1384_s25  }
  0x7b   : > { %s1659_s21 = sshll.u32 (!%p1518_p12), %s1656_s9, 3  ;;  %s389_s0 = scalar_lea.sflag (!%p1518_p12), [#allocation3], %s1656_s9 }
  0x7c   : > { %s392_s10 = scalar_lea.vmem (!%p1518_p12), [#allocation2], %s1659_s21 }
  0x7f   : > { %1355 = dma.done.wait (%p1504_p7), %s389_s0, 128  }
  0x80   : > { %1357 = vsyncadd (%p1504_p7), %s389_s0, 4294967168  ;;  %s397_s24 = sand.u32 1, %s1487_s30   ;;  %s401_s8 = scalar_lea.vmem [#allocation5], %s1659_s21 }
  0x81   : > { %s398_s14 = scalar_lea.sflag [#allocation6], %s397_s24 }
  0x82   : > { %1359 = dma.done.wait (%p1504_p7), %s398_s14, 256  }
  0x83   : > { %1361 = vsyncadd (%p1504_p7), %s398_s14, 4294967040  ;;  %s410_s19 = scalar_lea.vmem [#allocation7], %s1659_s21  ;;  %s416_s18 = scalar_lea.sflag [#allocation9], %s397_s24 }
  0x84   : > { %s419_s15 = scalar_lea.vmem [#allocation8], %s1659_s21 }
  0x85   : > { %1363 = dma.done.wait (%p1504_p7), %s416_s18, 128  }
  0x86   : > { %1365 = vsyncadd (%p1504_p7), %s416_s18, 4294967168  ;;  %p1804_p12 = scmp.eq.s32.totalorder %s1487_s30, 0 }
  0x88   : > { %1367 = dma.done.wait (%p1804_p12), [#allocation9], 256   ;;  %p1805_p9 = pmov %p1804_p12 }
  0x8a   : > { %1369 = vsyncadd (%p1805_p9), [#allocation9], 4294967040  ;;  %p1806_p5 = pmov %p1805_p9 }
  0x8c   : > { %1371 = dma.done.wait (%p1806_p5), [#allocation12], 256   ;;  %p1807_p4 = pmov %p1806_p5 }
  0x8d   : > { %v1412_v0 = vmov 0   ;;  %v1129_v1 = vld [vmem:[#allocation10 + $0x4] ss:$8 sps:$4 sm:$0xff]   ;;  %v1131_v2 = vld [vmem:[#allocation11 + $0x4] ss:$8 sps:$4 sm:$0xff]   ;;  %vm498_vm0 = vcmask 130048  }
  0x8e   : > { %1373 = vsyncadd (%p1807_p4), [#allocation12], 4294967040  ;;  %534 = vmatprep.mubr.bf16.mxu0 %v1412_v0  ;;  %597 = vmatprep.mubr.bf16.mxu1 %v1412_v0  ;;  %v1133_v3 = vld [vmem:[#allocation10] ss:$8 sps:$4 sm:$0xff]   ;;  %v1134_v4 = vld [vmem:[#allocation11] ss:$8 sps:$4 sm:$0xff]  }
  0x8f   : > { %516 = vmatprep.subr.bf16.mxu0 %v1129_v1  ;;  %579 = vmatprep.subr.bf16.mxu1 %v1131_v2  ;;  %v1135_v5 = vld [vmem:[%s392_s10] sm:$0xff]   ;;  %v1137_v7 = vld [vmem:[%s401_s8] sm:$0xff]   ;;  %s999_s23 = sshll.u32 %s1656_s9, 5  ;;  %s1023_s1 = sshll.u32 %s1392_s27, 9 }
  0x90   : > { %517 = vmatpush1.bf16.msra.mxu0 %v1133_v3  ;;  %580 = vmatpush1.bf16.msra.mxu1 %v1134_v4  ;;  %v1136_v6 = vld [vmem:[%s410_s19] sm:$0xff]   ;;  %v1138_v8 = vld [vmem:[%s419_s15] sm:$0xff]   ;;  %s472_s13 = scalar_lea.vmem [#allocation13], %s999_s23  ;;  %s1808_s7 = sld [smem:[#allocation28_spill]] }
  0x91   : > { %636 = vmatprep.subr.bf16.mxu0 %v1129_v1  ;;  %689 = vmatprep.subr.bf16.mxu1 %v1131_v2  ;;  %v1139_v39 = vld [vmem:[%s1760_s6] sm:$0xff]   ;;  %s801_s17 = sshll.u32 %s472_s13, 4  ;;  %s786_s4 = scalar_lea.sflag [#allocation4], %s1656_s9  ;;  %s1701_s17 = int_to_ptr.vmem [resolvable:$true] %s801_s17 }
  0x92   : > { %s1304_s22 = scalar_lea.vmem %s1701_s17, 512  ;;  %s1413_s27 = smov [#allocation13]  }
  0x93   : > { %1003 = vmatmul.mubr.msk.bf16.vlgmr.msra.gmra.mxu0 %vm498_vm0, %v1135_v5  ;;  %1007 = vmatmul.mubr.msk.bf16.vlgmr.msra.gmra.mxu1 %vm498_vm0, %v1136_v6  ;;  %p1305_p7 = scmp.ne.s32.totalorder %s1701_s17, %s1304_s22  ;;  %s1308_s21 = sshll.u32 %s1413_s27, 4  ;;  %s1309_s21 = int_to_ptr.vmem [resolvable:$false] %s1308_s21 }
  0x94   : > { %637 = vmatpush1.bf16.msra.mxu0 %v1133_v3  ;;  %690 = vmatpush1.bf16.msra.mxu1 %v1134_v4  ;;  %s1310_s0 = scalar_lea.vmem %s1309_s21, 1024  ;;  %p1311_p13 = scmp.lt.s32.totalorder %s1701_s17, %s1309_s21 }
  0x95   : > { %654 = vmatprep.mubr.bf16.mxu0 %v1412_v0  ;;  %707 = vmatprep.mubr.bf16.mxu1 %v1412_v0  ;;  %p1306_p10 = pnand %p1305_p7, %p1508_p8  ;;  %p1312_p3 = scmp.lt.s32.totalorder %s1310_s0, %s1304_s22 }
  0x96   : > { %s1706_s20 = scalar_lea.hbm %s1808_s7, %s1023_s1 }
  0x97   : > { %p1307_p11 = pneg %p1306_p10  ;;  %p1313_p0 = por %p1312_p3, %p1311_p13 }
  0x99   : > { %p1314_p6 = pnand %p1313_p0, %p1307_p11 }
  0x9b   : > { %1009 = vmatmul.mubr.msk.bf16.vlgmr.msra.gmra.mxu0 %vm498_vm0, %v1137_v7  ;;  %1011 = vmatmul.mubr.msk.bf16.vlgmr.msra.gmra.mxu1 %vm498_vm0, %v1138_v8 }
  0x9c   : > { %770 = vmatprep.mubr.bf16.mxu0 %v1412_v0 }
 0x153   : > { %v536_v9 = vpop.f32.mrf.mxu0  ;;  %v599_v10 = vpop.f32.mrf.mxu1 }
 0x154   : > { %v608_v32 = vmul.f32 %v599_v10, %v536_v9 }
 0x155   : > { %v538_v11 = vpop.f32.mrf.mxu0  ;;  %v601_v12 = vpop.f32.mrf.mxu1 }
 0x156   : > { %v609_v29 = vmul.f32 %v601_v12, %v538_v11 }
 0x157   : > { %v540_v13 = vpop.f32.mrf.mxu0  ;;  %v603_v14 = vpop.f32.mrf.mxu1 }
 0x158   : > { %v610_v25 = vmul.f32 %v603_v14, %v540_v13 }
 0x159   : > { %v542_v15 = vpop.f32.mrf.mxu0  ;;  %v605_v16 = vpop.f32.mrf.mxu1 }
 0x15a   : > { %v611_v30 = vmul.f32 %v605_v16, %v542_v15 }
 0x15b   : > { %v656_v17 = vpop.f32.mrf.mxu0  ;;  %v709_v18 = vpop.f32.mrf.mxu1 }
 0x15c   : > { %v718_v26 = vmul.f32 %v709_v18, %v656_v17 }
 0x15d   : > { %v658_v19 = vpop.f32.mrf.mxu0  ;;  %v711_v20 = vpop.f32.mrf.mxu1 }
 0x15e   : > { %v719_v23 = vmul.f32 %v711_v20, %v658_v19  ;;  %v722_v36 = vadd.f32 %v718_v26, %v608_v32 }
 0x15f   : > { %v660_v21 = vpop.f32.mrf.mxu0  ;;  %v713_v22 = vpop.f32.mrf.mxu1 }
 0x160   : > { %v720_v24 = vmul.f32 %v713_v22, %v660_v21  ;;  %v723_v34 = vadd.f32 %v719_v23, %v609_v29 }
 0x161   : > { %v662_v27 = vpop.f32.mrf.mxu0  ;;  %v715_v28 = vpop.f32.mrf.mxu1 }
 0x162   : > { %v721_v31 = vmul.f32 %v715_v28, %v662_v27  ;;  %v724_v33 = vadd.f32 %v720_v24, %v610_v25 }
 0x164   : > { %v725_v35 = vadd.f32 %v721_v31, %v611_v30  ;;  %v728_v38 = vpack.c.bf16 %v724_v33, %v722_v36 }
 0x166   : > { %v729_v37 = vpack.c.bf16 %v725_v35, %v723_v34 }
 0x168   : > { %752 = vmatprep.subr.bf16.mxu0 %v729_v37 }
 0x169   : > { %753 = vmatpush1.bf16.msra.mxu0 %v728_v38 }
 0x16c   : > { %1013 = vmatmul.mubr.msk.bf16.vlgmr.msra.gmra.mxu0 %vm498_vm0, %v1139_v39 }
 0x22c   : > { %v772_v40 = vpop.f32.mrf.mxu0 }
 0x22d   : > { %781 = vst [vmem:[%s472_s13] sm:$0xff] %v772_v40 }
 0x22e   : > { %v774_v41 = vpop.f32.mrf.mxu0 }
 0x22f   : > { %782 = vst [vmem:[%s472_s13 + $0x8] sm:$0xff] %v774_v41 }
 0x230   : > { %v776_v42 = vpop.f32.mrf.mxu0 }
 0x231   : > { %783 = vst [vmem:[%s472_s13 + $0x10] sm:$0xff] %v776_v42 }
 0x232   : > { %v778_v43 = vpop.f32.mrf.mxu0 }
 0x233   : > { %784 = vst [vmem:[%s472_s13 + $0x18] sm:$0xff] %v778_v43 }
 0x234   : > { %1317 = shalt.err (!%p1314_p6)
}
 0x235   : > { %s1318_s10 = scalar_lea.hbm %s1706_s20, 512  ;;  %s1322_s8 = scalar_lea.hbm %s1808_s7, 1024 }
 0x236   : > { %p1319_p1 = scmp.ne.s32.totalorder %s1706_s20, %s1318_s10  ;;  %p1323_p9 = scmp.lt.s32.totalorder %s1706_s20, %s1808_s7 }
 0x237   : > { %p1324_p5 = scmp.lt.s32.totalorder %s1322_s8, %s1318_s10 }
 0x238   : > { %p1320_p2 = pnand %p1319_p1, %p1508_p8 }
 0x239   : > { %p1325_p4 = por %p1324_p5, %p1323_p9 }
 0x23a   : > { %p1321_p12 = pneg %p1320_p2 }
 0x23c   : > { %p1326_p7 = pnand %p1325_p4, %p1321_p12 }
 0x23e   : > { %1329 = shalt.err (!%p1326_p7)
}
 0x23f   : > { %s1414_s15 = smov 256   ;;  %s1415_s30 = smov 16  }
 0x240   : > { %1040 = dma.vmem_to_hbm [thread:$0]  (%p1508_p8), %s1701_s17, 512, %s1706_s20, %s786_s4, %s1414_s15, %s1414_s15, %s1415_s30  }
 0x241 PF: > { %s1809_s11 = sld [smem:[#allocation20_spill]]  ;;  %p1812_p11 = scmp.ge.s32.totalorder %s1400_s29, 2 }
 0x242   : > { %s1810_s23 = sld [smem:[#allocation22_spill]] }
 0x247   : > { %s816_s13 = sand.u32 1, %s1809_s11  }
 0x248   : > { %p1811_p10 = scmp.ne.s32.totalorder %s1810_s23, 0  ;;  %s817_s1 = scalar_lea.sflag [#allocation4], %s816_s13 }
 0x24a   : > { %p1063_p13 = pnand %p1812_p11, %p1811_p10 }
 0x24c   : > { %p1064_p3 = pneg %p1063_p13 }
 0x24e   : > { %1375 = dma.done.wait (%p1064_p3), %s817_s1, 512  }
 0x24f   : > { %1377 = vsyncadd (%p1064_p3), %s817_s1, 4294966784  ;;  %s30_s29 = sadd.s32 1, %s1400_s29   ;;  %s1813_s12 = sld [smem:[#allocation24_spill]] }
 0x250   : > { %p27_p0 = scmp.ge.s32.totalorder %s30_s29, 4   ;;  %s1814_s27 = sld [smem:[#allocation21_spill]] }
 0x251   : > { %s1815_s28 = sld [smem:[#allocation23_spill]]  ;;  %s1816_s24 = smov %s1384_s25 }
 0x252   : > { %s1817_s25 = smov %s1388_s26  ;;  %29 = sbr.rel (!%p27_p0) target bundleno = 16 (0x10), region = 140 }
 0x255   : > { %s1818_s26 = smov %s1813_s12 }
 0x257   :  { %822 = vsyncpa [#allocation3], 1 }
 0x258   :  { %824 = vsyncpa [#allocation3 + $0x1], 1 }
 0x259   :  { %825 = vsyncpa [#allocation6], 1 }
 0x25a   :  { %827 = vsyncpa [#allocation6 + $0x1], 1 }
 0x25b   :  { %828 = vsyncpa [#allocation9], 1 }
 0x25c   :  { %830 = vsyncpa [#allocation9 + $0x1], 1 }
 0x25d   :  { %831 = vsyncpa [#allocation12], 1 }
 0x25e   :  { %832 = vsyncpa [#allocation4], 1 }
 0x25f   :  { %834 = vsyncpa [#allocation4 + $0x1], 1 }

</bundles_post_ra>
